<compile_context>
chip_gen: v7x
topology: tpu7x:2x2x1
jax: 0.10.0
libtpu: 0.0.40
codegen_flags: <defaults>
</compile_context>

<pallas_src>
import math

import jax
import jax.numpy as jnp
from jax.experimental import pallas as pl
from jax.experimental.pallas import tpu as pltpu


def _round_up(x, m):
    return ((x + m - 1) // m) * m


# ---------------------------------------------------------------------------
# Kernel: one batch tile, all (padded, resident) weights in VMEM.
# ---------------------------------------------------------------------------
def qnn_kernel(x_ref, w1_ref, b1_ref, w2_ref, b2_ref, w3_ref, b3_ref, o_ref):
    # x arrives as f32 (no wrapper cast pass); cast to bf16 for the MXU.
    x = x_ref[...].astype(w1_ref.dtype)
    # layer 1: x @ W1^T + b1, ReLU  (bf16 MXU, f32 accumulate, f32 elementwise)
    h1 = jnp.dot(x, w1_ref[...], preferred_element_type=jnp.float32)
    h1 = jnp.maximum(h1 + b1_ref[...], 0.0)
    # layer 2: h1 @ W2^T + b2, ReLU
    h2 = jnp.dot(h1.astype(w2_ref.dtype), w2_ref[...],
                 preferred_element_type=jnp.float32)
    h2 = jnp.maximum(h2 + b2_ref[...], 0.0)
    # layer 3: h2 @ W3^T + b3 (no activation; Q-values). Lane-dense 128-wide
    # bf16 store (halves output HBM traffic).
    h3 = jnp.dot(h2.astype(w3_ref.dtype), w3_ref[...],
                 preferred_element_type=jnp.float32)
    o_ref[...] = (h3 + b3_ref[...]).astype(o_ref.dtype)


# ---------------------------------------------------------------------------
# Parameter packing: pad hidden/output dims, cast weights to bf16 once.
# Padded output columns get bias -1e30 so argmax over the padded buffer is safe.
# ---------------------------------------------------------------------------
def pack_params(params, act_dtype=jnp.bfloat16):
    w1t, b1 = params["w1t"], params["b1"]
    w2t, b2 = params["w2t"], params["b2"]
    w3t, b3 = params["w3t"], params["b3"]
    in_dim, n1 = w1t.shape
    _, n2 = w2t.shape
    _, out_dim = w3t.shape
    n1p = _round_up(n1, 8)          # 3  -> 8   (ReLU-neutral zero padding)
    n2p = _round_up(n2, 8)          # 30 -> 32
    outp = _round_up(out_dim, 128)  # 81 -> 128 (lane-dense output)

    def pad2(a, r, c, val=0.0):
        return jnp.pad(a, ((0, r - a.shape[0]), (0, c - a.shape[1])),
                       constant_values=val)

    return {
        "w1t": pad2(w1t, in_dim, n1p).astype(act_dtype),
        "b1": pad2(b1, 1, n1p).astype(jnp.float32),
        "w2t": pad2(w2t, n1p, n2p).astype(act_dtype),
        "b2": pad2(b2, 1, n2p).astype(jnp.float32),
        "w3t": pad2(w3t, n2p, outp).astype(act_dtype),
        # -1e30 on padded Q-value lanes: can never win an argmax.
        "b3": pad2(b3, 1, outp, val=-1e30).astype(jnp.float32),
        "out_dim": out_dim,
    }


# ---------------------------------------------------------------------------
# Forward wrapper: batch grid (partial last tile allowed), weights resident,
# x / out pipelined, bf16 output.
# ---------------------------------------------------------------------------
def qnn_forward(x, packed, *, tb_max=2048, return_padded=False):
    B, in_dim = x.shape
    n1p = packed["w1t"].shape[1]
    n2p = packed["w2t"].shape[1]
    outp = packed["w3t"].shape[1]
    out_dim = packed["out_dim"]

    # Batch tile: big (amortize ~0.35us per-step overhead), multiple of 16
    # (bf16 sublane packing on the output), and at most ceil(B/2) so large
    # batches produce >= 2 grid steps (both TensorCores on v7x).
    TB = min(tb_max, max(16, _round_up(pl.cdiv(B, 2), 16)))
    grid = (pl.cdiv(B, TB),)

    def resident(shape):
        # Weights/biases: same block every grid step -> stay VMEM-resident.
        return pl.BlockSpec(shape, lambda i: (0, 0))

    flops = 2 * B * (in_dim * n1p + n1p * n2p + n2p * outp)
    weight_bytes = sum(
        packed[k].size * packed[k].dtype.itemsize
        for k in ("w1t", "b1", "w2t", "b2", "w3t", "b3"))
    bytes_accessed = (x.size * x.dtype.itemsize        # f32 x read
                      + B * outp * 2                   # bf16 output write
                      + weight_bytes)

    out = pl.pallas_call(
        qnn_kernel,
        out_shape=jax.ShapeDtypeStruct((B, outp), jnp.bfloat16),
        grid=grid,
        in_specs=[
            pl.BlockSpec((TB, in_dim), lambda i: (i, 0)),   # x streamed per tile
            resident((in_dim, n1p)),
            resident((1, n1p)),
            resident((n1p, n2p)),
            resident((1, n2p)),
            resident((n2p, outp)),
            resident((1, outp)),
        ],
        out_specs=pl.BlockSpec((TB, outp), lambda i: (i, 0)),
        compiler_params=pltpu.CompilerParams(
            dimension_semantics=("parallel",)),
        cost_estimate=pl.CostEstimate(
            flops=flops, bytes_accessed=bytes_accessed, transcendentals=0),
    )(x, packed["w1t"], packed["b1"], packed["w2t"], packed["b2"],
      packed["w3t"], packed["b3"])

    if return_padded:
        # (B, 128) bf16; padded lanes hold ~-1e30 so argmax stays correct.
        return out
    # Last-dim slice to the true Q-value count (fuses into the consumer).
    return out[:, :out_dim]


# ---------------------------------------------------------------------------
# Init mimicking torch.nn.Linear default U[-1/sqrt(fan_in), 1/sqrt(fan_in)].
# Weights stored pre-transposed: (in_dim, out_dim).
# ---------------------------------------------------------------------------
def init_qnn_params(key, n_assets, n1=3, n2=30):
    in_dim = 2 * n_assets + 1
    out_dim = 3 ** n_assets
    dims = [(in_dim, n1), (n1, n2), (n2, out_dim)]
    params = {}
    keys = jax.random.split(key, 6)
    for i, (fi, fo) in enumerate(dims, start=1):
        bound = 1.0 / math.sqrt(fi)
        params[f"w{i}t"] = jax.random.uniform(
            keys[2 * (i - 1)], (fi, fo), jnp.float32, -bound, bound)
        params[f"b{i}"] = jax.random.uniform(
            keys[2 * (i - 1) + 1], (1, fo), jnp.float32, -bound, bound)
    return params


# ---------------------------------------------------------------------------
# References
# ---------------------------------------------------------------------------
def _ref_packed(x, packed):
    """Mirrors the kernel's numerics (bf16 inputs/activations, f32 accumulate)."""
    act = packed["w1t"].dtype
    hp = jax.lax.Precision.HIGHEST
    f32 = jnp.float32
    h = x.astype(act).astype(f32)
    h = jnp.maximum(
        jnp.dot(h, packed["w1t"].astype(f32), precision=hp) + packed["b1"], 0.0)
    h = h.astype(act).astype(f32)
    h = jnp.maximum(
        jnp.dot(h, packed["w2t"].astype(f32), precision=hp) + packed["b2"], 0.0)
    h = h.astype(act).astype(f32)
    out = jnp.dot(h, packed["w3t"].astype(f32), precision=hp) + packed["b3"]
    return out[:, :packed["out_dim"]]


def _ref_f32(x, params):
    """Pure f32 torch-semantics reference."""
    hp = jax.lax.Precision.HIGHEST
    h = jnp.maximum(jnp.dot(x, params["w1t"], precision=hp) + params["b1"], 0.0)
    h = jnp.maximum(jnp.dot(h, params["w2t"], precision=hp) + params["b2"], 0.0)
    return jnp.dot(h, params["w3t"], precision=hp) + params["b3"]


# TODO(synk): train_on_batch (MSE loss backward + SGD-with-momentum step) is
# optimizer/autograd state, not part of the forward pass; not implemented here.

if __name__ == "__main__":
    n_assets = 4            # input dim = 2*4 + 1 = 9, output dim = 3**4 = 81
    batch = 8               # small single-env batch

    key = jax.random.PRNGKey(0)
    pkey, xkey, xkey2 = jax.random.split(key, 3)
    params = init_qnn_params(pkey, n_assets)
    packed = pack_params(params)

    # --- small batch (single grid step, partial tile) ---
    x = jax.random.normal(xkey, (batch, 2 * n_assets + 1), jnp.float32)
    out = jax.block_until_ready(qnn_forward(x, packed))
    assert out.shape == (batch, 3 ** n_assets)
    out_f32 = out.astype(jnp.float32)
    assert jnp.allclose(out_f32, _ref_packed(x, packed), atol=2e-2, rtol=2e-2)
    assert jnp.allclose(out_f32, _ref_f32(x, params), atol=6e-2, rtol=6e-2)

    # --- larger, non-multiple batch (multi-step grid + over-running last tile) ---
    x2 = jax.random.normal(xkey2, (1000, 2 * n_assets + 1), jnp.float32)
    out2 = jax.block_until_ready(qnn_forward(x2, packed))
    assert out2.shape == (1000, 3 ** n_assets)
    assert jnp.allclose(out2.astype(jnp.float32), _ref_packed(x2, packed),
                        atol=2e-2, rtol=2e-2)

    # --- padded-output path (no slice pass; padded lanes are -1e30) ---
    out_pad = jax.block_until_ready(qnn_forward(x2, packed, return_padded=True))
    assert out_pad.shape == (1000, 128)
    assert jnp.array_equal(jnp.argmax(out_pad, axis=-1),
                           jnp.argmax(out2, axis=-1))

    print("KERNEL_OK")
</pallas_src>

<mosaic_0001>
module attributes {stable_mosaic.version = 11 : i64} {
  func.func @qnn_kernel(%arg0: i32, %arg1: memref<16x9xf32, #tpu.memory_space<vmem>>, %arg2: memref<9x8xbf16, #tpu.memory_space<vmem>>, %arg3: memref<1x8xf32, #tpu.memory_space<vmem>>, %arg4: memref<8x32xbf16, #tpu.memory_space<vmem>>, %arg5: memref<1x32xf32, #tpu.memory_space<vmem>>, %arg6: memref<32x128xbf16, #tpu.memory_space<vmem>>, %arg7: memref<1x128xf32, #tpu.memory_space<vmem>>, %arg8: memref<16x128xbf16, #tpu.memory_space<vmem>>) attributes {dimension_semantics = [#tpu.dimension_semantics<parallel>], iteration_bounds = array<i64: 1>, scalar_prefetch = 0 : i64, scratch_operands = 0 : i64, tpu.core_type = #tpu.core_type<tc>, window_params = [{transform_indices = @transform_0, window_bounds = array<i64: 16, 9>}, {pipeline_mode = #tpu.pipeline_mode<synchronous>, transform_indices = @transform_1, window_bounds = array<i64: 9, 8>}, {pipeline_mode = #tpu.pipeline_mode<synchronous>, transform_indices = @transform_2, window_bounds = array<i64: 1, 8>}, {pipeline_mode = #tpu.pipeline_mode<synchronous>, transform_indices = @transform_3, window_bounds = array<i64: 8, 32>}, {pipeline_mode = #tpu.pipeline_mode<synchronous>, transform_indices = @transform_4, window_bounds = array<i64: 1, 32>}, {pipeline_mode = #tpu.pipeline_mode<synchronous>, transform_indices = @transform_5, window_bounds = array<i64: 32, 128>}, {pipeline_mode = #tpu.pipeline_mode<synchronous>, transform_indices = @transform_6, window_bounds = array<i64: 1, 128>}, {transform_indices = @transform_7, window_bounds = array<i64: 16, 128>}]} {
    %c0 = arith.constant 0 : index
    %c0_0 = arith.constant 0 : index
    %0 = vector.load %arg1[%c0, %c0_0] : memref<16x9xf32, #tpu.memory_space<vmem>>, vector<16x9xf32>
    %1 = arith.truncf %0 : vector<16x9xf32> to vector<16x9xbf16>
    %c0_1 = arith.constant 0 : index
    %c0_2 = arith.constant 0 : index
    %2 = vector.load %arg2[%c0_1, %c0_2] : memref<9x8xbf16, #tpu.memory_space<vmem>>, vector<9x8xbf16>
    %cst = arith.constant dense<0.000000e+00> : vector<16x8xf32>
    %3 = tpu.matmul %1, %2, %cst {dimension_numbers = #tpu.dot_dimension_numbers<[1], [0], [0], [1], [0, 0, 1, 1], [], []>} : vector<16x9xbf16>, vector<9x8xbf16>, vector<16x8xf32> -> vector<16x8xf32>
    %c0_3 = arith.constant 0 : index
    %c0_4 = arith.constant 0 : index
    %4 = vector.load %arg3[%c0_3, %c0_4] : memref<1x8xf32, #tpu.memory_space<vmem>>, vector<1x8xf32>
    %5 = vector.broadcast %4 : vector<1x8xf32> to vector<16x8xf32>
    %6 = arith.addf %3, %5 : vector<16x8xf32>
    %cst_5 = arith.constant 0.000000e+00 : f32
    %7 = vector.broadcast %cst_5 : f32 to vector<16x8xf32>
    %8 = arith.maximumf %6, %7 : vector<16x8xf32>
    %9 = arith.truncf %8 : vector<16x8xf32> to vector<16x8xbf16>
    %c0_6 = arith.constant 0 : index
    %c0_7 = arith.constant 0 : index
    %10 = vector.load %arg4[%c0_6, %c0_7] : memref<8x32xbf16, #tpu.memory_space<vmem>>, vector<8x32xbf16>
    %cst_8 = arith.constant dense<0.000000e+00> : vector<16x32xf32>
    %11 = tpu.matmul %9, %10, %cst_8 {dimension_numbers = #tpu.dot_dimension_numbers<[1], [0], [0], [1], [0, 0, 1, 1], [], []>} : vector<16x8xbf16>, vector<8x32xbf16>, vector<16x32xf32> -> vector<16x32xf32>
    %c0_9 = arith.constant 0 : index
    %c0_10 = arith.constant 0 : index
    %12 = vector.load %arg5[%c0_9, %c0_10] : memref<1x32xf32, #tpu.memory_space<vmem>>, vector<1x32xf32>
    %13 = vector.broadcast %12 : vector<1x32xf32> to vector<16x32xf32>
    %14 = arith.addf %11, %13 : vector<16x32xf32>
    %cst_11 = arith.constant 0.000000e+00 : f32
    %15 = vector.broadcast %cst_11 : f32 to vector<16x32xf32>
    %16 = arith.maximumf %14, %15 : vector<16x32xf32>
    %17 = arith.truncf %16 : vector<16x32xf32> to vector<16x32xbf16>
    %c0_12 = arith.constant 0 : index
    %c0_13 = arith.constant 0 : index
    %18 = vector.load %arg6[%c0_12, %c0_13] : memref<32x128xbf16, #tpu.memory_space<vmem>>, vector<32x128xbf16>
    %cst_14 = arith.constant dense<0.000000e+00> : vector<16x128xf32>
    %19 = tpu.matmul %17, %18, %cst_14 {dimension_numbers = #tpu.dot_dimension_numbers<[1], [0], [0], [1], [0, 0, 1, 1], [], []>} : vector<16x32xbf16>, vector<32x128xbf16>, vector<16x128xf32> -> vector<16x128xf32>
    %c0_15 = arith.constant 0 : index
    %c0_16 = arith.constant 0 : index
    %20 = vector.load %arg7[%c0_15, %c0_16] : memref<1x128xf32, #tpu.memory_space<vmem>>, vector<1x128xf32>
    %21 = vector.broadcast %20 : vector<1x128xf32> to vector<16x128xf32>
    %22 = arith.addf %19, %21 : vector<16x128xf32>
    %23 = arith.truncf %22 : vector<16x128xf32> to vector<16x128xbf16>
    %c0_17 = arith.constant 0 : index
    %c0_18 = arith.constant 0 : index
    %24 = vector.load %arg8[%c0_17, %c0_18] : memref<16x128xbf16, #tpu.memory_space<vmem>>, vector<16x128xbf16>
    tpu.vector_store %arg8[%c0_17, %c0_18], %23 {strides = array<i32>} : memref<16x128xbf16, #tpu.memory_space<vmem>>, vector<16x128xbf16>,
    return
  }
  func.func @transform_0(%arg0: i32) -> (i32, i32) {
    %c0_i32 = arith.constant 0 : i32
    %c0_i32_0 = arith.constant 0 : i32
    return %arg0, %c0_i32 : i32, i32
  }
  func.func @transform_1(%arg0: i32) -> (i32, i32) {
    %c0_i32 = arith.constant 0 : i32
    %c0_i32_0 = arith.constant 0 : i32
    %c0_i32_1 = arith.constant 0 : i32
    return %c0_i32, %c0_i32_0 : i32, i32
  }
  func.func @transform_2(%arg0: i32) -> (i32, i32) {
    %c0_i32 = arith.constant 0 : i32
    %c0_i32_0 = arith.constant 0 : i32
    %c0_i32_1 = arith.constant 0 : i32
    return %c0_i32, %c0_i32_0 : i32, i32
  }
  func.func @transform_3(%arg0: i32) -> (i32, i32) {
    %c0_i32 = arith.constant 0 : i32
    %c0_i32_0 = arith.constant 0 : i32
    %c0_i32_1 = arith.constant 0 : i32
    return %c0_i32, %c0_i32_0 : i32, i32
  }
  func.func @transform_4(%arg0: i32) -> (i32, i32) {
    %c0_i32 = arith.constant 0 : i32
    %c0_i32_0 = arith.constant 0 : i32
    %c0_i32_1 = arith.constant 0 : i32
    return %c0_i32, %c0_i32_0 : i32, i32
  }
  func.func @transform_5(%arg0: i32) -> (i32, i32) {
    %c0_i32 = arith.constant 0 : i32
    %c0_i32_0 = arith.constant 0 : i32
    %c0_i32_1 = arith.constant 0 : i32
    return %c0_i32, %c0_i32_0 : i32, i32
  }
  func.func @transform_6(%arg0: i32) -> (i32, i32) {
    %c0_i32 = arith.constant 0 : i32
    %c0_i32_0 = arith.constant 0 : i32
    %c0_i32_1 = arith.constant 0 : i32
    return %c0_i32, %c0_i32_0 : i32, i32
  }
  func.func @transform_7(%arg0: i32) -> (i32, i32) {
    %c0_i32 = arith.constant 0 : i32
    %c0_i32_0 = arith.constant 0 : i32
    return %arg0, %c0_i32 : i32, i32
  }
}

</mosaic_0001>

<bundles_post_ra>
// kernel: tpu_custom_call.1
= control target key start
LH: loop header
LB: loop body
LE: loop exit
PB: predicated region body
PF: predicated region fallthrough
CT: control target
= control target key end

     0   :  { %12 = vsyncpa [#allocation3], 0  ;;  %vm49_vm0 = vcmask 1043456   ;;  %v331_v0 = vmov 0.0   ;;  %vm50_vm1 = vcmask 1044480   ;;  %v332_v2 = vmov 65535   ;;  %s418_s0 = inlined_call_operand.vmem [shape: f32[8,9], index: 0, kind: input, shape index: {}]   ;;  %s419_s1 = inlined_call_operand.vmem [shape: bf16[9,8], index: 1, kind: input, shape index: {}]   ;;  %s420_s2 = inlined_call_operand.vmem [shape: f32[1,8], index: 2, kind: input, shape index: {}]   ;;  %s421_s3 = inlined_call_operand.vmem [shape: bf16[8,32], index: 3, kind: input, shape index: {}]   ;;  %s422_s4 = inlined_call_operand.vmem [shape: f32[1,32], index: 4, kind: input, shape index: {}]   ;;  %s423_s5 = inlined_call_operand.vmem [shape: bf16[32,128], index: 5, kind: input, shape index: {}]   ;;  %s424_s6 = inlined_call_operand.vmem [shape: f32[1,128], index: 6, kind: input, shape index: {}]   ;;  %s425_s7 = inlined_call_operand.hbm [shape: bf16[8,128], index: 7, kind: output, shape index: {}]  }
   0x1   :  { %278 = vmatprep.subr.bf16.mxu0 %v331_v0  ;;  %v304_v1 = vld [vmem:[%s419_s1] sm:$0x1f]   ;;  %284 = vmatprep.subr.bf16.mxu1 %v331_v0  ;;  %v51_v3 = vsel %vm49_vm0, 4294967295, %v332_v2  ;;  %v29_v5 = vld [vmem:[%s418_s0 + $0x8] sm:$0xff]  ;;  %vm333_vm2 = vmmov 0   ;;  %vm45_vm3 = vcmask 72704  }
   0x2   :  { %v28_v4 = vld [vmem:[%s418_s0] sm:$0xff]  ;;  %v52_v6 = vsel %vm50_vm1, %v51_v3, 0  ;;  %280 = vmatprep.mubr.msk.bf16.mxu0 %vm333_vm2, %v331_v0  ;;  %286 = vmatprep.mubr.msk.bf16.mxu1 %vm333_vm2, %v331_v0  ;;  %vm108_vm4 = vcmask 64512   ;;  %v306_v22 = vld [vmem:[%s423_s5 + $0x8] sm:$0xff]   ;;  %vm182_vm5 = vcmask 261120  }
   0x3   :  { %v54_v7 = vand.u32 %v304_v1, %v52_v6  ;;  %v30_v8 = vpack.c.bf16 %v29_v5, %v28_v4  ;;  %v100_v9 = vld [vmem:[%s421_s3] sm:$0xf] }
   0x4   :  { %v113_v10 = vsel %vm49_vm0, %v100_v9, 0  ;;  %v253_v11 = vld [vmem:[%s420_s2] ss:$0 sm:$0xff] }
   0x5   :  { %279 = vmatpush3.bf16.msra.mxu0 %v54_v7  ;;  %285 = vmatpush3.bf16.msra.mxu1 %v113_v10  ;;  %v305_v21 = vld [vmem:[%s423_s5] sm:$0xff]  }
   0x6   :  { %290 = vmatprep.subr.bf16.mxu0 %v331_v0  ;;  %v256_v23 = vld [vmem:[%s422_s4] ss:$0 sm:$0xff] }
   0x7   :  { %v258_v33 = vld [vmem:[%s424_s6] ss:$0 sm:$0xff] }
   0x8   :  { %281 = vmatmul.mubr.msk.bf16.vlgmr.msra.gmra.mrb[0].mxu0 %vm45_vm3, %v30_v8 }
   0x9   :  { %294 = vmatprep.mubr.msk.bf16.mxu0 %vm333_vm2, %v331_v0  ;;  %291 = vmatpush3.bf16.msra.mxu0 %v305_v21 }
   0xa   :  { %292 = vmatprep.subr.bf16.mxu0 %v331_v0 }
   0xd   :  { %293 = vmatpush3.bf16.msra.mxu0 %v306_v22 }
  0xdb   :  { %v90_v12 = vpop.f32.mrb[0].mxu0 }
  0xdc   :  { %v91_v13 = vadd.f32 %v253_v11, %v90_v12  ;;  %v282_v14 = vpop.f32.mrb[1].mxu0 }
  0xdd   :  { %v93_v15 = vpop.f32.mrb[2].mxu0 }
  0xde   :  { %v94_v16 = vadd.f32 %v253_v11, %v93_v15  ;;  %v283_v17 = vpop.f32.mrb[3].mxu0  ;;  %v97_v18 = vmax.f32 %v91_v13, 0.0 }
  0xe0   :  { %v98_v19 = vmax.f32 %v94_v16, 0.0 }
  0xe2   :  { %v99_v20 = vpack.c.bf16 %v98_v19, %v97_v18 }
  0xe4   :  { %287 = vmatmul.mubr.msk.bf16.vlgmr.msra.gmra.mrb[0].mxu1 %vm108_vm4, %v99_v20 }
 0x1b7   :  { %v149_v24 = vpop.f32.mrb[0].mxu1 }
 0x1b8   :  { %v150_v25 = vadd.f32 %v256_v23, %v149_v24  ;;  %v288_v26 = vpop.f32.mrb[1].mxu1 }
 0x1b9   :  { %v152_v27 = vpop.f32.mrb[2].mxu1 }
 0x1ba   :  { %v153_v28 = vadd.f32 %v256_v23, %v152_v27  ;;  %v289_v29 = vpop.f32.mrb[3].mxu1  ;;  %v156_v30 = vmax.f32 %v150_v25, 0.0 }
 0x1bc   :  { %v157_v31 = vmax.f32 %v153_v28, 0.0 }
 0x1be   :  { %v158_v32 = vpack.c.bf16 %v157_v31, %v156_v30 }
 0x1c0   :  { %295 = vmatmul.mubr.msk.bf16.vlgmr.msra.gmra.mrb[4].mxu0 %vm182_vm5, %v158_v32 }
 0x293   :  { %v220_v34 = vpop.f32.mrb[4].mxu0 }
 0x294   :  { %v296_v35 = vpop.f32.mrb[5].mxu0  ;;  %v221_v37 = vadd.f32 %v258_v33, %v220_v34 }
 0x295   :  { %v223_v36 = vpop.f32.mrb[6].mxu0 }
 0x296   :  { %v224_v38 = vadd.f32 %v258_v33, %v223_v36  ;;  %v297_v39 = vpop.f32.mrb[7].mxu0 }
 0x298   :  { %v269_v40 = vpack.c.bf16 %v224_v38, %v221_v37 }
 0x29a   :  { %270 = vst [vmem:[#allocation2] sm:$0xff] %v269_v40  }
 0x29b   :  { %241 = vsyncadd [#allocation3], 64  ;;  %s334_s4 = smov [#allocation2]  }
 0x29c   :  { %s242_s5 = sshll.u32 %s334_s4, 4  ;;  %s243_s5 = int_to_ptr.vmem [resolvable:$true] %s242_s5 }
 0x29d   :  { %s307_s15 = scalar_lea.vmem %s243_s5, 64  ;;  %s311_s16 = scalar_lea.vmem %s243_s5, 128 }
 0x29e   :  { %p308_p0 = scmp.ne.s32.totalorder %s243_s5, %s307_s15  ;;  %p312_p1 = scmp.lt.s32.totalorder %s243_s5, %s243_s5 }
 0x29f   :  { %p313_p2 = scmp.lt.s32.totalorder %s311_s16, %s307_s15 }
 0x2a1   :  { %p314_p3 = por %p313_p2, %p312_p1 }
 0x2a3   :  { %p315_p4 = pnand %p314_p3, %p308_p0 }
 0x2a5   :  { %318 = shalt.err (!%p315_p4)
}
 0x2a6   :  { %s319_s18 = scalar_lea.hbm %s425_s7, 64 }
 0x2a7   :  { %p320_p5 = scmp.ne.s32.totalorder %s425_s7, %s319_s18  ;;  %p323_p6 = scmp.lt.u32.totalorder %s319_s18, %s425_s7 }
 0x2a9   :  { %p325_p7 = pnand %p323_p6, %p320_p5 }
 0x2ab   :  { %328 = shalt.err (!%p325_p7)
}
 0x2ac   :  { %s335_s23 = smov 64   ;;  %s336_s24 = smov 4  }
 0x2ad   :  { %248 = dma.vmem_to_hbm [thread:$0]  %s243_s5, 64, %s425_s7, [#allocation3], %s335_s23, %s335_s23, %s336_s24  }
 0x2ae   :  { %329 = dma.done.wait [#allocation3], 128  }
 0x2af   :  { %330 = vsyncadd [#allocation3], 4294967168 }
 0x2b0   :  { %252 = vsyncpa [#allocation3], 1 }

</bundles_post_ra>
